<compile_context>
chip_gen: v7x
topology: tpu7x:2x2x1
jax: 0.10.0
libtpu: 0.0.40
codegen_flags: <defaults>
</compile_context>

<pallas_src>
import jax
import jax.numpy as jnp
from jax.experimental import pallas as pl
from jax.experimental.pallas import tpu as pltpu

_LANES = 128


def _round_up(n: int, m: int) -> int:
    return ((n + m - 1) // m) * m


def _regresion_ciclica_kernel(x_ref, r_ref, phi_ref, bias_ref, o_ref):
    # x_ref:    (D, TILE_B)  lane-dense batch tile
    # r_ref:    (D, 1)       folded weight magnitude  sqrt(w_sin^2 + w_cos^2)
    # phi_ref:  (D, 1)       folded weight phase      atan2(w_cos, w_sin)
    # bias_ref: (1, 1) SMEM  folded bias              b_sin + b_cos
    # o_ref:    (1, TILE_B)  lane-dense output row
    x = x_ref[...]
    if x.dtype != jnp.float32:  # keep f32 compute for the bf16-input path (v5e)
        x = x.astype(jnp.float32)
    y = r_ref[...] * jnp.sin(x + phi_ref[...])       # VPU mul + 1 transcendental/elem
    acc = jnp.sum(y, axis=0, keepdims=True)          # sublane reduce -> (1, TILE_B)
    o_ref[...] = (acc + bias_ref[0, 0]).astype(o_ref.dtype)


def regresion_ciclica(x, w_sin, b_sin, w_cos, b_cos, *, tile_b: int = 8192):
    """x: (B, D); w_*: (D, 1); b_*: (1, 1) -> (B, 1)"""
    B, D = x.shape

    # ---- wrapper-side parameter folding (tiny) ------------------------------
    w_s = w_sin.reshape(D).astype(jnp.float32)
    w_c = w_cos.reshape(D).astype(jnp.float32)
    r = jnp.sqrt(w_s * w_s + w_c * w_c).reshape(D, 1)
    phi = jnp.arctan2(w_c, w_s).reshape(D, 1)
    bias = (b_sin.reshape(()) + b_cos.reshape(())).astype(jnp.float32).reshape(1, 1)

    # ---- lane-dense layout + batch padding to the tile size -----------------
    tile_b = max(_LANES, min(tile_b, _round_up(B, _LANES)))   # multiple of 128
    B_pad = _round_up(B, tile_b)
    xt = jnp.swapaxes(x, 0, 1)                                # (D, B)
    if B_pad != B:
        xt = jnp.pad(xt, ((0, 0), (0, B_pad - B)))
    num_tiles = B_pad // tile_b

    out_row = pl.pallas_call(
        _regresion_ciclica_kernel,
        out_shape=jax.ShapeDtypeStruct((1, B_pad), x.dtype),
        grid=(num_tiles,),
        in_specs=[
            pl.BlockSpec((D, tile_b), lambda i: (0, i)),        # x tile (pipelined)
            pl.BlockSpec((D, 1), lambda i: (0, 0)),             # r   (stays resident)
            pl.BlockSpec((D, 1), lambda i: (0, 0)),             # phi (stays resident)
            pl.BlockSpec(memory_space=pltpu.MemorySpace.SMEM),  # folded bias scalar
        ],
        out_specs=pl.BlockSpec((1, tile_b), lambda i: (0, i)),
        compiler_params=pltpu.CompilerParams(
            dimension_semantics=("parallel",),     # shard batch tiles across TCs (v7x)
            vmem_limit_bytes=32 * 1024 * 1024,     # headroom vs v7x's 64 MiB physical
        ),
        cost_estimate=pl.CostEstimate(
            flops=3 * B_pad * D + B_pad,
            transcendentals=B_pad * D,
            bytes_accessed=4 * B_pad * D + 4 * B_pad + 8 * D + 4,
        ),
    )(xt, r, phi, bias)

    return out_row.reshape(B_pad, 1)[:B].astype(x.dtype)


def _reference(x, w_sin, b_sin, w_cos, b_cos):
    return jnp.sin(x) @ w_sin + b_sin + jnp.cos(x) @ w_cos + b_cos


def init_params(key, input_dim):
    """Deterministic init matching nn.Linear's U(-1/sqrt(fan_in), 1/sqrt(fan_in))."""
    k1, k2, k3, k4 = jax.random.split(key, 4)
    bound = 1.0 / jnp.sqrt(jnp.float32(input_dim))
    w_sin = jax.random.uniform(k1, (input_dim, 1), jnp.float32, -bound, bound)
    b_sin = jax.random.uniform(k2, (1, 1), jnp.float32, -bound, bound)
    w_cos = jax.random.uniform(k3, (input_dim, 1), jnp.float32, -bound, bound)
    b_cos = jax.random.uniform(k4, (1, 1), jnp.float32, -bound, bound)
    return w_sin, b_sin, w_cos, b_cos


if __name__ == "__main__":
    key = jax.random.PRNGKey(0)
    k_x, k_x2, k_p = jax.random.split(key, 3)

    input_dim = 32
    w_sin, b_sin, w_cos, b_cos = init_params(k_p, input_dim)

    # Small shape consistent with the module.
    batch = 8
    x = jax.random.normal(k_x, (batch, input_dim), dtype=jnp.float32)
    out = jax.block_until_ready(regresion_ciclica(x, w_sin, b_sin, w_cos, b_cos))
    ref = _reference(x, w_sin, b_sin, w_cos, b_cos)
    assert out.shape == (batch, 1)
    assert jnp.allclose(out, ref, atol=1e-4, rtol=1e-4), float(jnp.max(jnp.abs(out - ref)))

    # Exercise multi-tile grid + batch padding (non-multiple-of-tile batch).
    batch2 = 1000
    x2 = jax.random.normal(k_x2, (batch2, input_dim), dtype=jnp.float32)
    out2 = jax.block_until_ready(
        regresion_ciclica(x2, w_sin, b_sin, w_cos, b_cos, tile_b=256)
    )
    ref2 = _reference(x2, w_sin, b_sin, w_cos, b_cos)
    assert out2.shape == (batch2, 1)
    assert jnp.allclose(out2, ref2, atol=1e-4, rtol=1e-4), float(jnp.max(jnp.abs(out2 - ref2)))

    print("KERNEL_OK")
</pallas_src>

<mosaic_0001>
module attributes {stable_mosaic.version = 11 : i64} {
  func.func @_regresion_ciclica_kernel(%arg0: i32, %arg1: memref<32x128xf32, #tpu.memory_space<vmem>>, %arg2: memref<32x1xf32, #tpu.memory_space<vmem>>, %arg3: memref<32x1xf32, #tpu.memory_space<vmem>>, %arg4: memref<1x1xf32, #tpu.memory_space<smem>>, %arg5: memref<1x128xf32, #tpu.memory_space<vmem>>) attributes {dimension_semantics = [#tpu.dimension_semantics<parallel>], iteration_bounds = array<i64: 1>, scalar_prefetch = 0 : i64, scratch_operands = 0 : i64, tpu.core_type = #tpu.core_type<tc>, window_params = [{transform_indices = @transform_0, window_bounds = array<i64: 32, 128>}, {pipeline_mode = #tpu.pipeline_mode<synchronous>, transform_indices = @transform_1, window_bounds = array<i64: 32, 1>}, {pipeline_mode = #tpu.pipeline_mode<synchronous>, transform_indices = @transform_2, window_bounds = array<i64: 32, 1>}, {transform_indices = @transform_3, window_bounds = array<i64: 1, 1>}, {transform_indices = @transform_4, window_bounds = array<i64: 1, 128>}]} {
    %c0 = arith.constant 0 : index
    %c0_0 = arith.constant 0 : index
    %0 = vector.load %arg1[%c0, %c0_0] : memref<32x128xf32, #tpu.memory_space<vmem>>, vector<32x128xf32>
    %c0_1 = arith.constant 0 : index
    %c0_2 = arith.constant 0 : index
    %1 = vector.load %arg2[%c0_1, %c0_2] : memref<32x1xf32, #tpu.memory_space<vmem>>, vector<32x1xf32>
    %c0_3 = arith.constant 0 : index
    %c0_4 = arith.constant 0 : index
    %2 = vector.load %arg3[%c0_3, %c0_4] : memref<32x1xf32, #tpu.memory_space<vmem>>, vector<32x1xf32>
    %3 = vector.broadcast %2 : vector<32x1xf32> to vector<32x128xf32>
    %4 = arith.addf %0, %3 : vector<32x128xf32>
    %5 = math.sin %4 : vector<32x128xf32>
    %6 = vector.broadcast %1 : vector<32x1xf32> to vector<32x128xf32>
    %7 = arith.mulf %6, %5 : vector<32x128xf32>
    %cst = arith.constant dense<0.000000e+00> : vector<128xf32>
    %8 = vector.multi_reduction <add>, %7, %cst [0] : vector<32x128xf32> to vector<128xf32>
    %9 = vector.shape_cast %8 : vector<128xf32> to vector<1x128xf32>
    %c0_5 = arith.constant 0 : index
    %c0_6 = arith.constant 0 : index
    %10 = memref.load %arg4[%c0_5, %c0_6] : memref<1x1xf32, #tpu.memory_space<smem>>
    %11 = vector.broadcast %10 : f32 to vector<1x128xf32>
    %12 = arith.addf %9, %11 : vector<1x128xf32>
    %c0_7 = arith.constant 0 : index
    %c0_8 = arith.constant 0 : index
    %13 = vector.load %arg5[%c0_7, %c0_8] : memref<1x128xf32, #tpu.memory_space<vmem>>, vector<1x128xf32>
    tpu.vector_store %arg5[%c0_7, %c0_8], %12 {strides = array<i32>} : memref<1x128xf32, #tpu.memory_space<vmem>>, vector<1x128xf32>,
    return
  }
  func.func @transform_0(%arg0: i32) -> (i32, i32) {
    %c0_i32 = arith.constant 0 : i32
    %c0_i32_0 = arith.constant 0 : i32
    return %c0_i32, %arg0 : i32, i32
  }
  func.func @transform_1(%arg0: i32) -> (i32, i32) {
    %c0_i32 = arith.constant 0 : i32
    %c0_i32_0 = arith.constant 0 : i32
    %c0_i32_1 = arith.constant 0 : i32
    return %c0_i32, %c0_i32_0 : i32, i32
  }
  func.func @transform_2(%arg0: i32) -> (i32, i32) {
    %c0_i32 = arith.constant 0 : i32
    %c0_i32_0 = arith.constant 0 : i32
    %c0_i32_1 = arith.constant 0 : i32
    return %c0_i32, %c0_i32_0 : i32, i32
  }
  func.func @transform_3(%arg0: i32) -> (i32, i32) {
    %c0_i32 = arith.constant 0 : i32
    %c0_i32_0 = arith.constant 0 : i32
    %c0_i32_1 = arith.constant 0 : i32
    return %c0_i32, %c0_i32_0 : i32, i32
  }
  func.func @transform_4(%arg0: i32) -> (i32, i32) {
    %c0_i32 = arith.constant 0 : i32
    %c0_i32_0 = arith.constant 0 : i32
    return %c0_i32, %arg0 : i32, i32
  }
}

</mosaic_0001>

<bundles_post_ra>
// kernel: tpu_custom_call.1
= control target key start
LH: loop header
LB: loop body
LE: loop exit
PB: predicated region body
PF: predicated region fallthrough
CT: control target
= control target key end

     0   :  { %v604_v2 = vmov 0   ;;  %s1058_s0 = inlined_call_operand.vmem [shape: f32[32,128], index: 0, kind: input, shape index: {}]   ;;  %s1059_s1 = inlined_call_operand.vmem [shape: f32[32,1], index: 1, kind: input, shape index: {}]   ;;  %s1060_s2 = inlined_call_operand.vmem [shape: f32[32,1], index: 2, kind: input, shape index: {}]   ;;  %s1061_s3 = inlined_call_operand.<no memory space> [shape: f32[1,1], index: 3, kind: input, shape index: {}]   ;;  %s1062_s4 = inlined_call_operand.hbm [shape: f32[1,128], index: 4, kind: output, shape index: {}]  }
   0x1   :  { %v29_v0 = vld [vmem:[%s1060_s2 + $0x10] sm:$0xff]  ;;  %v27_v1 = vld [vmem:[%s1060_s2] sm:$0xff]  ;;  %563 = vset.pattern.permute.xlu1 %v604_v2  ;;  %562 = vset.pattern.permute.xlu0 %v604_v2  ;;  %v30_v3 = vld [vmem:[%s1060_s2 + $0x18] sm:$0xff] }
   0x2   :  { %43 = vperm.xlu1 %563, %v29_v0   ;;  %33 = vperm.xlu0 %562, %v27_v1   ;;  %v28_v4 = vld [vmem:[%s1060_s2 + $0x8] sm:$0xff] }
   0x3   :  { %10 = vsyncpa [#allocation4], 0  ;;  %v24_v5 = vld [vmem:[%s1059_s1 + $0x8] sm:$0xff]  ;;  %v23_v6 = vld [vmem:[%s1059_s1] sm:$0xff]  ;;  %v605_v46 = vmov 2102212464  }
   0x4   :  { %v26_v7 = vld [vmem:[%s1059_s1 + $0x18] sm:$0xff]  ;;  %v25_v8 = vld [vmem:[%s1059_s1 + $0x10] sm:$0xff]  ;;  %v19_v9 = vld [vmem:[%s1058_s0] sm:$0xff]  ;;  %v606_v48 = vmov 920167782   ;;  %s611_s12 = smov [#allocation3]  }
   0x5   :  { %v21_v12 = vld [vmem:[%s1058_s0 + $0x10] sm:$0xff]  ;;  %v22_v14 = vld [vmem:[%s1058_s0 + $0x18] sm:$0xff]  ;;  %v20_v15 = vld [vmem:[%s1058_s0 + $0x8] sm:$0xff]  ;;  %v607_v52 = vmov 1326507024   ;;  %s514_s13 = sshll.u32 %s611_s12, 4  ;;  %s515_s13 = int_to_ptr.vmem [resolvable:$true] %s514_s13 }
   0x6   :  { %48 = vperm.xlu1 %563, %v30_v3   ;;  %38 = vperm.xlu0 %562, %v28_v4   ;;  %s580_s14 = scalar_lea.vmem %s515_s13, 16  ;;  %s584_s15 = scalar_lea.vmem %s515_s13, 32 }
   0x7   :  { %p581_p0 = scmp.ne.s32.totalorder %s515_s13, %s580_s14  ;;  %p585_p1 = scmp.lt.s32.totalorder %s515_s13, %s515_s13 }
   0x8   :  { %p586_p2 = scmp.lt.s32.totalorder %s584_s15, %s580_s14 }
   0xa   :  { %478 = vperm.xlu1 %563, %v24_v5   ;;  %473 = vperm.xlu0 %562, %v23_v6   ;;  %p587_p3 = por %p586_p2, %p585_p1 }
   0xc   :  { %p588_p4 = pnand %p587_p3, %p581_p0 }
   0xe   :  { %488 = vperm.xlu1 %563, %v26_v7   ;;  %483 = vperm.xlu0 %562, %v25_v8  }
  0x81   :  { %v44_v10 = vpop.permute.xlu1 %43  ;;  %v34_v11 = vpop.permute.xlu0 %33 }
  0x82   :  { %v667_v13 = vadd.f32 %v34_v11, %v19_v9  ;;  %v676_v17 = vadd.f32 %v44_v10, %v21_v12  ;;  %v608_v12 = vmov 683565275  }
  0x84   :  { %v58_v16 = vand.u32 2139095040, %v667_v13  ;;  %v266_v25 = vand.u32 2139095040, %v676_v17  ;;  %v55_v27 = vand.u32 2147483647, %v667_v13 }
  0x85   :  { %v49_v18 = vpop.permute.xlu1 %48  ;;  %v39_v19 = vpop.permute.xlu0 %38 }
  0x86   :  { %v59_v20 = vshrl.u32 %v58_v16, 23  ;;  %v678_v21 = vadd.f32 %v49_v18, %v22_v14  ;;  %v680_v22 = vadd.f32 %v39_v19, %v20_v15  ;;  %v267_v33 = vshrl.u32 %v266_v25, 23 }
  0x87   :  { %v62_v36 = vand.u32 8388607, %v55_v27  ;;  %v609_v15 = vmov 2475754826   ;;  %v610_v19 = vmov 2131351028  }
  0x88   :  { %v522_v23 = vadd.s32 4294967169, %v59_v20  ;;  %v370_v24 = vand.u32 2139095040, %v678_v21  ;;  %v162_v26 = vand.u32 2139095040, %v680_v22  ;;  %v159_v30 = vand.u32 2147483647, %v680_v22 }
  0x89   :  { %v530_v41 = vadd.s32 4294967169, %v267_v33  ;;  %v63_v43 = vor.u32 8388608, %v62_v36  ;;  %v367_v63 = vand.u32 2147483647, %v678_v21 }
  0x8a   :  { %v65_v28 = vadd.s32 1, %v522_v23  ;;  %v371_v29 = vshrl.u32 %v370_v24, 23  ;;  %v163_v31 = vshrl.u32 %v162_v26, 23  ;;  %v166_v38 = vand.u32 8388607, %v159_v30 }
  0x8b   :  { %v710_v57 = vadd.s32 1, %v530_v41  ;;  %v717_v60 = vshll.u32 %v63_v43, 8 }
  0x8c   :  { %vm66_vm0 = vcmp.gt.s32.totalorder %v65_v28, 0  ;;  %v534_v32 = vadd.s32 4294967169, %v371_v29  ;;  %v526_v35 = vadd.s32 4294967169, %v163_v31  ;;  %v167_v45 = vor.u32 8388608, %v166_v38 }
  0x8d   :  { %v67_v34 = vsel %vm66_vm0, %v65_v28, 0  ;;  %vm274_vm13 = vcmp.gt.s32.totalorder %v710_v57, 0 }
  0x8e   :  { %v689_v37 = vand.u32 31, %v67_v34  ;;  %v377_v39 = vadd.s32 1, %v534_v32  ;;  %v169_v40 = vadd.s32 1, %v526_v35  ;;  %v696_v44 = vshrl.u32 %v67_v34, 5 }
  0x8f   :  { %v722_v62 = vshll.u32 %v167_v45, 8 }
  0x90   :  { %v694_v42 = vsub.s32 32, %v689_v37  ;;  %vm378_vm1 = vcmp.gt.s32.totalorder %v377_v39, 0  ;;  %vm170_vm2 = vcmp.gt.s32.totalorder %v169_v40, 0  ;;  %v81_v47 = vshll.u32 %v605_v46, %v689_v37 }
  0x91   :  { %v379_v50 = vsel %vm378_vm1, %v377_v39, 0  ;;  %v171_v51 = vsel %vm170_vm2, %v169_v40, 0  ;;  %v84_v58 = vshll.u32 %v606_v48, %v689_v37  ;;  %vm90_vm3 = vcmp.lt.s32.totalorder %v696_v44, 4 }
  0x92   :  { %v82_v49 = vshrl.u32 %v606_v48, %v694_v42  ;;  %v704_v53 = vshrl.u32 %v607_v52, %v694_v42  ;;  %v706_v54 = vand.u32 31, %v379_v50  ;;  %v173_v56 = vand.u32 31, %v171_v51 }
  0x93   :  { %v720_v61 = vshrl.u32 %v379_v50, 5  ;;  %v172_v2 = vshrl.u32 %v171_v51, 5  ;;  %v72_v39 = vshll.u32 %v608_v12, %v689_v37  ;;  %v73_v40 = vshrl.u32 %v609_v15, %v694_v42 }
  0x94   :  { %v708_v55 = vor.u32 %v82_v49, %v81_v47  ;;  %v715_v59 = vsub.s32 32, %v706_v54  ;;  %v86_v0 = vor.u32 %v704_v53, %v84_v58  ;;  %v393_v1 = vshll.u32 %v605_v46, %v706_v54 }
  0x95   :  { %v174_v3 = vsub.s32 32, %v173_v56  ;;  %v737_v6 = vshll.u32 %v606_v48, %v706_v54  ;;  %v185_v8 = vshll.u32 %v605_v46, %v173_v56  ;;  %v188_v10 = vshll.u32 %v606_v48, %v173_v56 }
  0x96   :  { %v731_v4 = vsel %vm90_vm3, %v708_v55, 920167782  ;;  %v394_v5 = vshrl.u32 %v606_v48, %v715_v59  ;;  %v741_v7 = vshrl.u32 %v607_v52, %v715_v59  ;;  %v176_v14 = vshll.u32 %v608_v12, %v173_v56 }
  0x97   :  { %v186_v9 = vshrl.u32 %v606_v48, %v174_v3  ;;  %v189_v11 = vshrl.u32 %v607_v52, %v174_v3  ;;  %v177_v16 = vshrl.u32 %v609_v15, %v174_v3  ;;  %v179_v18 = vshll.u32 %v609_v15, %v173_v56 }
  0x98   :  { %v180_v20 = vshrl.u32 %v610_v19, %v174_v3  ;;  %vm194_vm4 = vcmp.lt.s32.totalorder %v172_v2, 4  ;;  %v175_v25 = vshrl.u32 %v608_v12, %v174_v3  ;;  %v182_v29 = vshll.u32 %v610_v19, %v173_v56 }
  0x99   :  { %v187_v23 = vor.u32 %v186_v9, %v185_v8  ;;  %v190_v24 = vor.u32 %v189_v11, %v188_v10  ;;  %v178_v26 = vor.u32 %v177_v16, %v176_v14  ;;  %v183_v31 = vshrl.u32 %v605_v46, %v174_v3 }
  0x9a   :  { %v181_v28 = vor.u32 %v180_v20, %v179_v18  ;;  %vm191_vm5 = vcmp.lt.s32.totalorder %v172_v2, 1  ;;  %vm193_vm6 = vcmp.lt.s32.totalorder %v172_v2, 3  ;;  %vm192_vm7 = vcmp.lt.s32.totalorder %v172_v2, 2 }
  0x9b   :  { %v200_v32 = vsel %vm194_vm4, %v187_v23, 920167782  ;;  %v204_v33 = vsel %vm194_vm4, %v190_v24, 1326507024  ;;  %v184_v34 = vor.u32 %v183_v31, %v182_v29  ;;  %v195_v38 = vsel %vm191_vm5, %v175_v25, %v178_v26 }
  0x9c   :  { %v199_v35 = vsel %vm191_vm5, %v178_v26, %v181_v28  ;;  %v205_v36 = vsel %vm193_vm6, %v187_v23, %v204_v33  ;;  %v75_v41 = vshll.u32 %v609_v15, %v689_v37  ;;  %v76_v49 = vshrl.u32 %v610_v19, %v694_v42 }
  0x9d   :  { %v196_v43 = vsel %vm194_vm4, %v184_v34, 2102212464  ;;  %v201_v45 = vsel %vm193_vm6, %v184_v34, %v200_v32  ;;  %v203_v47 = vsel %vm191_vm5, %v181_v28, %v184_v34  ;;  %v74_v56 = vor.u32 %v73_v40, %v72_v39 }
  0x9e   :  { %v197_v50 = vsel %vm193_vm6, %v181_v28, %v196_v43  ;;  %v202_v51 = vsel %vm192_vm7, %v199_v35, %v201_v45  ;;  %v206_v53 = vsel %vm192_vm7, %v203_v47, %v205_v36  ;;  %v77_v9 = vor.u32 %v76_v49, %v75_v41 }
  0x9f   :  { %v198_v58 = vsel %vm192_vm7, %v195_v38, %v197_v50  ;;  %v766_v3 = vmul.u32.u64.low %v722_v62, %v206_v53  ;;  %v767_v8 = vmul.u32.u64.high %v722_v62, %v206_v53, %v766_v3  ;;  %v100_v10 = vsel %vm90_vm3, %v86_v0, 1326507024 }
  0xa0   :  { %vm402_vm8 = vcmp.lt.s32.totalorder %v720_v61, 4  ;;  %v773_v2 = vmul.u32.u64.low %v722_v62, %v202_v51  ;;  %v774_v11 = vmul.u32.u64.high %v722_v62, %v202_v51, %v773_v2  ;;  %v395_v14 = vor.u32 %v394_v5, %v393_v1 }
  0xa1   :  { %v398_v16 = vor.u32 %v741_v7, %v737_v6  ;;  %v78_v18 = vshll.u32 %v610_v19, %v689_v37  ;;  %v79_v20 = vshrl.u32 %v605_v46, %v694_v42  ;;  %v214_v23 = vmul.u32 %v722_v62, %v198_v58 }
  0xa2   :  { %v71_v0 = vshrl.u32 %v608_v12, %v694_v42  ;;  %vm87_vm9 = vcmp.lt.s32.totalorder %v696_v44, 1  ;;  %vm89_vm10 = vcmp.lt.s32.totalorder %v696_v44, 3  ;;  %vm216_vm11 = vc.u32 %v767_v8, %v773_v2 }
  0xa3   :  { %v80_v1 = vor.u32 %v79_v20, %v78_v18  ;;  %v95_v5 = vsel %vm87_vm9, %v74_v56, %v77_v9  ;;  %v101_v37 = vsel %vm89_vm10, %v708_v55, %v100_v10  ;;  %v217_v6 = vadd.s32 1, %v774_v11 }
  0xa4   :  { %vm88_vm12 = vcmp.lt.s32.totalorder %v696_v44, 2  ;;  %v91_v62 = vsel %vm87_vm9, %v71_v0, %v74_v56  ;;  %v374_v42 = vand.u32 8388607, %v367_v63  ;;  %v385_v26 = vshrl.u32 %v609_v15, %v715_v59 }
  0xa5   :  { %v92_v7 = vsel %vm90_vm3, %v80_v1, 2102212464  ;;  %v97_v24 = vsel %vm89_vm10, %v80_v1, %v731_v4  ;;  %v99_v25 = vsel %vm87_vm9, %v77_v9, %v80_v1  ;;  %v218_v55 = vsel %vm216_vm11, %v217_v6, %v774_v11 }
  0xa6   :  { %v98_v28 = vsel %vm88_vm12, %v95_v5, %v97_v24  ;;  %v102_v29 = vsel %vm88_vm12, %v99_v25, %v101_v37  ;;  %v384_v31 = vshll.u32 %v608_v12, %v706_v54  ;;  %v219_v32 = vadd.s32 %v218_v55, %v214_v23 }
  0xa7   :  { %v93_v33 = vsel %vm89_vm10, %v77_v9, %v92_v7  ;;  %v814_v4 = vmul.u32.u64.low %v717_v60, %v102_v29  ;;  %v815_v34 = vmul.u32.u64.high %v717_v60, %v102_v29, %v814_v4  ;;  %v408_v35 = vsel %vm402_vm8, %v395_v14, 920167782 }
  0xa8   :  { %v821_v36 = vmul.u32.u64.low %v717_v60, %v98_v28  ;;  %v822_v38 = vmul.u32.u64.high %v717_v60, %v98_v28, %v821_v36  ;;  %v220_v39 = vadd.s32 536870912, %v219_v32  ;;  %v386_v40 = vor.u32 %v385_v26, %v384_v31 }
  0xa9   :  { %v387_v41 = vshll.u32 %v609_v15, %v706_v54  ;;  %v388_v43 = vshrl.u32 %v610_v19, %v715_v59  ;;  %v412_v45 = vsel %vm402_vm8, %v398_v16, 1326507024  ;;  %v94_v47 = vsel %vm88_vm12, %v91_v62, %v93_v33 }
  0xaa   :  { %v390_v49 = vshll.u32 %v610_v19, %v706_v54  ;;  %v391_v50 = vshrl.u32 %v605_v46, %v715_v59  ;;  %v837_v51 = vshrl.u32 %v220_v39, 30  ;;  %vm112_vm14 = vc.u32 %v815_v34, %v821_v36 }
  0xab   :  { %v375_v53 = vor.u32 8388608, %v374_v42  ;;  %v389_v56 = vor.u32 %v388_v43, %v387_v41  ;;  %v113_v58 = vadd.s32 1, %v822_v38  ;;  %vm399_vm15 = vcmp.lt.s32.totalorder %v720_v61, 1 }
  0xac   :  { %v392_v3 = vor.u32 %v391_v50, %v390_v49  ;;  %vm401_vm0 = vcmp.lt.s32.totalorder %v720_v61, 3  ;;  %v222_v44 = vshll.u32 %v837_v51, 30  ;;  %v110_v54 = vmul.u32 %v717_v60, %v94_v47 }
  0xad   :  { %v407_v9 = vsel %vm399_vm15, %v386_v40, %v389_v56  ;;  %v413_v10 = vsel %vm401_vm0, %v395_v14, %v412_v45  ;;  %v114_v11 = vsel %vm112_vm14, %v113_v58, %v822_v38  ;;  %v383_v0 = vshrl.u32 %v608_v12, %v715_v59 }
  0xae   :  { %v404_v16 = vsel %vm402_vm8, %v392_v3, 2102212464  ;;  %v409_v18 = vsel %vm401_vm0, %v392_v3, %v408_v35  ;;  %v411_v20 = vsel %vm399_vm15, %v389_v56, %v392_v3  ;;  %v857_v23 = vsub.s32 %v219_v32, %v222_v44 }
  0xaf   :  { %v115_v60 = vadd.s32 %v114_v11, %v110_v54  ;;  %vm400_vm1 = vcmp.lt.s32.totalorder %v720_v61, 2  ;;  %v275_v14 = vsel %vm274_vm13, %v710_v57, 0  ;;  %v415_v37 = vshll.u32 %v375_v53, 8 }
  0xb0   :  { %v410_v1 = vsel %vm400_vm1, %v407_v9, %v409_v18  ;;  %v414_v5 = vsel %vm400_vm1, %v411_v20, %v413_v10  ;;  %v225_v6 = vsub.s32 0, %v857_v23  ;;  %v403_v42 = vsel %vm399_vm15, %v383_v0, %v386_v40 }
  0xb1   :  { %v116_v62 = vadd.s32 536870912, %v115_v60  ;;  %v405_v59 = vsel %vm401_vm0, %v389_v56, %v404_v16  ;;  %v874_v7 = vmul.u32.u64.low %v415_v37, %v414_v5  ;;  %v875_v24 = vmul.u32.u64.high %v415_v37, %v414_v5, %v874_v7 }
  0xb2   :  { %v877_v57 = vmul.u32.u64.low %v415_v37, %v410_v1  ;;  %v878_v25 = vmul.u32.u64.high %v415_v37, %v410_v1, %v877_v57  ;;  %v277_v26 = vand.u32 31, %v275_v14  ;;  %v527_v55 = vmin.u32 %v225_v6, %v857_v23 }
  0xb3   :  { %v882_v28 = vshrl.u32 %v116_v62, 30  ;;  %v406_v29 = vsel %vm400_vm1, %v403_v42, %v405_v59  ;;  %v898_v50 = vshrl.u32 %v275_v14, 5  ;;  %v263_v58 = vand.u32 2147483647, %v676_v17 }
  0xb4   :  { %v227_v31 = vclz %v527_v55  ;;  %vm424_vm2 = vc.u32 %v875_v24, %v877_v57  ;;  %v278_v33 = vsub.s32 32, %v277_v26  ;;  %v425_v4 = vadd.s32 1, %v878_v25 }
  0xb5   :  { %v118_v32 = vshll.u32 %v882_v28, 30  ;;  %v422_v38 = vmul.u32 %v415_v37, %v406_v29  ;;  %v289_v61 = vshll.u32 %v605_v46, %v277_v26  ;;  %v292_v47 = vshll.u32 %v606_v48, %v277_v26 }
  0xb6   :  { %v426_v39 = vsel %vm424_vm2, %v425_v4, %v878_v25  ;;  %v528_v40 = vadd.s32 4294967294, %v227_v31  ;;  %v290_v45 = vshrl.u32 %v606_v48, %v278_v33  ;;  %v293_v49 = vshrl.u32 %v607_v52, %v278_v33 }
  0xb7   :  { %v890_v35 = vsub.s32 %v115_v60, %v118_v32  ;;  %v427_v43 = vadd.s32 %v426_v39, %v422_v38  ;;  %v283_v3 = vshll.u32 %v609_v15, %v277_v26  ;;  %v284_v44 = vshrl.u32 %v610_v19, %v278_v33 }
  0xb8   :  { %v286_v54 = vshll.u32 %v610_v19, %v277_v26  ;;  %v287_v9 = vshrl.u32 %v605_v46, %v278_v33  ;;  %vm529_vm3 = vcmp.lt.s32.totalorder %v528_v40, 0  ;;  %v280_v48 = vshll.u32 %v608_v12, %v277_v26 }
  0xb9   :  { %v121_v41 = vsub.s32 0, %v890_v35  ;;  %v428_v56 = vadd.s32 536870912, %v427_v43  ;;  %v281_v52 = vshrl.u32 %v609_v15, %v278_v33  ;;  %v291_v11 = vor.u32 %v290_v45, %v289_v61 }
  0xba   :  { %v294_v16 = vor.u32 %v293_v49, %v292_v47  ;;  %v270_v60 = vand.u32 8388607, %v263_v58  ;;  %v230_v0 = vsel %vm529_vm3, 0, %v528_v40  ;;  %v285_v19 = vor.u32 %v284_v44, %v283_v3 }
  0xbb   :  { %v523_v53 = vmin.u32 %v121_v41, %v890_v35  ;;  %v908_v18 = vshrl.u32 %v428_v56, 30  ;;  %v288_v1 = vor.u32 %v287_v9, %v286_v54  ;;  %vm298_vm4 = vcmp.lt.s32.totalorder %v898_v50, 4 }
  0xbc   :  { %v282_v46 = vor.u32 %v281_v52, %v280_v48  ;;  %v304_v15 = vsel %vm298_vm4, %v291_v11, 920167782  ;;  %v308_v5 = vsel %vm298_vm4, %v294_v16, 1326507024  ;;  %v235_v62 = vsub.s32 4294967266, %v230_v0 }
  0xbd   :  { %v123_v10 = vclz %v523_v53  ;;  %v430_v14 = vshll.u32 %v908_v18, 30  ;;  %v279_v42 = vshrl.u32 %v608_v12, %v278_v33  ;;  %vm295_vm6 = vcmp.lt.s32.totalorder %v898_v50, 1 }
  0xbe   :  { %v271_v7 = vor.u32 8388608, %v270_v60  ;;  %vm297_vm7 = vcmp.lt.s32.totalorder %v898_v50, 3  ;;  %v307_v25 = vsel %vm295_vm6, %v285_v19, %v288_v1  ;;  %v303_v55 = vsel %vm295_vm6, %v282_v46, %v285_v19 }
  0xbf   :  { %v524_v20 = vadd.s32 4294967294, %v123_v10  ;;  %v918_v6 = vsub.s32 %v427_v43, %v430_v14  ;;  %v305_v29 = vsel %vm297_vm7, %v288_v1, %v304_v15  ;;  %v309_v12 = vsel %vm297_vm7, %v291_v11, %v308_v5 }
  0xc0   :  { %vm296_vm8 = vcmp.lt.s32.totalorder %v898_v50, 2  ;;  %v236_v32 = vadd.s32 127, %v235_v62  ;;  %v300_v33 = vsel %vm298_vm4, %v288_v1, 2102212464  ;;  %v311_v40 = vshll.u32 %v271_v7, 8 }
  0xc1   :  { %vm525_vm5 = vcmp.lt.s32.totalorder %v524_v20, 0  ;;  %v433_v59 = vsub.s32 0, %v918_v6  ;;  %v310_v4 = vsel %vm296_vm8, %v307_v25, %v309_v12  ;;  %v306_v39 = vsel %vm296_vm8, %v303_v55, %v305_v29 }
  0xc2   :  { %v126_v37 = vsel %vm525_vm5, 0, %v524_v20  ;;  %v215_v41 = vadd.s32 %v773_v2, %v767_v8  ;;  %v231_v43 = vsub.s32 32, %v230_v0  ;;  %v299_v45 = vsel %vm295_vm6, %v279_v42, %v282_v46 }
  0xc3   :  { %v131_v26 = vsub.s32 4294967266, %v126_v37  ;;  %v535_v31 = vmin.u32 %v433_v59, %v918_v6  ;;  %v301_v49 = vsel %vm297_vm7, %v285_v19, %v300_v33  ;;  %v237_v3 = vshll.u32 %v236_v32, 23 }
  0xc4   :  { %v946_v53 = vmul.u32.u64.low %v311_v40, %v310_v4  ;;  %v947_v56 = vmul.u32.u64.high %v311_v40, %v310_v4, %v946_v53  ;;  %v127_v44 = vsub.s32 32, %v126_v37  ;;  %v111_v8 = vadd.s32 %v821_v36, %v815_v34 }
  0xc5   :  { %v435_v38 = vclz %v535_v31  ;;  %v132_v61 = vadd.s32 127, %v131_v26  ;;  %v949_v54 = vmul.u32.u64.low %v311_v40, %v306_v39  ;;  %v950_v9 = vmul.u32.u64.high %v311_v40, %v306_v39, %v949_v54 }
  0xc6   :  { %v233_v2 = vshrl.u32 %v215_v41, %v231_v43  ;;  %v302_v52 = vsel %vm296_vm8, %v299_v45, %v301_v49  ;;  %v232_v11 = vshll.u32 %v857_v23, %v230_v0  ;;  %v238_v20 = vor.u32 4788187, %v237_v3 }
  0xc7   :  { %v536_v47 = vadd.s32 4294967294, %v435_v38  ;;  %v133_v10 = vshll.u32 %v132_v61, 23  ;;  %v129_v60 = vshrl.u32 %v111_v8, %v127_v44  ;;  %vm320_vm10 = vc.u32 %v947_v56, %v949_v54 }
  0xc8   :  { %v321_v14 = vadd.s32 1, %v950_v9  ;;  %v318_v1 = vmul.u32 %v311_v40, %v302_v52  ;;  %v234_v34 = vor.u32 %v233_v2, %v232_v11  ;;  %v128_v36 = vshll.u32 %v890_v35, %v126_v37 }
  0xc9   :  { %vm537_vm9 = vcmp.lt.s32.totalorder %v536_v47, 0  ;;  %v134_v46 = vor.u32 4788187, %v133_v10  ;;  %v239_v62 = vand.u32 2147483647, %v238_v20  ;;  %v423_v0 = vadd.s32 %v877_v57, %v875_v24 }
  0xca   :  { %v438_v48 = vsel %vm537_vm9, 0, %v536_v47  ;;  %v322_v15 = vsel %vm320_vm10, %v321_v14, %v950_v9  ;;  %v130_v23 = vor.u32 %v129_v60, %v128_v36  ;;  %v241_v7 = vcvt.s32.f32 %v234_v34 }
  0xcb   :  { %v443_v16 = vsub.s32 4294967266, %v438_v48  ;;  %v439_v50 = vsub.s32 32, %v438_v48  ;;  %v323_v5 = vadd.s32 %v322_v15, %v318_v1  ;;  %v135_v25 = vand.u32 2147483647, %v134_v46 }
  0xcc   :  { %v242_v29 = vmul.f32 %v241_v7, %v239_v62  ;;  %v137_v12 = vcvt.s32.f32 %v130_v23  ;;  %v440_v35 = vshll.u32 %v918_v6, %v438_v48  ;;  %vm161_vm11 = vcmp.lt.s32.totalorder %v680_v22, 0 }
  0xcd   :  { %v444_v19 = vadd.s32 127, %v443_v16  ;;  %v324_v59 = vadd.s32 536870912, %v323_v5  ;;  %v441_v26 = vshrl.u32 %v423_v0, %v439_v50  ;;  %vm57_vm12 = vcmp.lt.s32.totalorder %v667_v13, 0 }
  0xce   :  { %v138_v32 = vmul.f32 %v137_v12, %v135_v25  ;;  %v243_v38 = vxor.u32 2147483648, %v242_v29  ;;  %vm975_vm13 = vcmp.le.f32.partialorder %v159_v30, 0.7853982  ;;  %v245_v3 = vsub.s32 4, %v837_v51 }
  0xcf   :  { %v445_v42 = vshll.u32 %v444_v19, 23  ;;  %v965_v55 = vshrl.u32 %v324_v59, 30  ;;  %v442_v33 = vor.u32 %v441_v26, %v440_v35  ;;  %vm987_vm14 = vcmp.le.f32.partialorder %v55_v27, 0.7853982 }
  0xd0   :  { %v139_v57 = vxor.u32 2147483648, %v138_v32  ;;  %v244_v43 = vsel %vm161_vm11, %v243_v38, %v242_v29  ;;  %v319_v2 = vadd.s32 %v949_v54, %v947_v56  ;;  %vm369_vm0 = vcmp.lt.s32.totalorder %v678_v21, 0 }
  0xd1   :  { %v446_v37 = vor.u32 4788187, %v445_v42  ;;  %v326_v31 = vshll.u32 %v965_v55, 30  ;;  %v449_v40 = vcvt.s32.f32 %v442_v33  ;;  %v247_v49 = vsel %vm975_vm13, %v680_v22, %v244_v43 }
  0xd2   :  { %v140_v47 = vsel %vm57_vm12, %v139_v57, %v138_v32  ;;  %564 = vcosq.f32 %v247_v49  ;;  %v246_v27 = vsel %vm161_vm11, %v245_v3, %v837_v51  ;;  %v141_v52 = vsub.s32 4, %v882_v28 }
  0xd3   :  { %v327_v4 = vsub.s32 %v323_v5, %v326_v31  ;;  %v447_v39 = vand.u32 2147483647, %v446_v37  ;;  %v143_v30 = vsel %vm987_vm14, %v667_v13, %v140_v47  ;;  %566 = vsinq.f32 %v247_v49 }
  0xd4   :  { %568 = vcosq.f32 %v143_v30  ;;  %v248_v56 = vsel %vm975_vm13, 0, %v246_v27  ;;  %vm1007_vm1 = vcmp.le.f32.partialorder %v367_v63, 0.7853982  ;;  %v142_v19 = vsel %vm57_vm12, %v141_v52, %v882_v28 }
  0xd5   :  { %v329_v24 = vsub.s32 0, %v327_v4  ;;  %v450_v6 = vmul.f32 %v449_v40, %v447_v39  ;;  %570 = vsinq.f32 %v143_v30  ;;  %v453_v34 = vsub.s32 4, %v908_v18 }
  0xd6   :  { %v252_v46 = vadd.s32 3, %v248_v56  ;;  %v144_v63 = vsel %vm987_vm14, 0, %v142_v19  ;;  %v349_v0 = vsub.s32 4, %v965_v55  ;;  %vm265_vm2 = vcmp.lt.s32.totalorder %v676_v17, 0 }
  0xd7   :  { %v531_v41 = vmin.u32 %v329_v24, %v327_v4  ;;  %v451_v9 = vxor.u32 2147483648, %v450_v6  ;;  %v454_v28 = vsel %vm369_vm0, %v453_v34, %v908_v18  ;;  %v148_v59 = vadd.s32 3, %v144_v63 }
  0xd8   :  { %v253_v7 = vand.u32 3, %v252_v46  ;;  %v456_v29 = vsel %vm1007_vm1, 0, %v454_v28  ;;  %vm1029_vm3 = vcmp.le.f32.partialorder %v263_v58, 0.7853982  ;;  %v350_v31 = vsel %vm265_vm2, %v349_v0, %v965_v55 }
  0xd9   :  { %v331_v61 = vclz %v531_v41  ;;  %v452_v11 = vsel %vm369_vm0, %v451_v9, %v450_v6  ;;  %v149_v32 = vand.u32 3, %v148_v59  ;;  %v460_v39 = vadd.s32 3, %v456_v29  ;;  %v479_v9 = vpop.permute.xlu1 %478 }
  0xda   :  { %v455_v1 = vsel %vm1007_vm1, %v678_v21, %v452_v11  ;;  %vm255_vm4 = vcmp.eq.s32.totalorder %v253_v7, 0  ;;  %vm258_vm5 = vcmp.eq.s32.totalorder %v253_v7, 2  ;;  %v352_v58 = vsel %vm1029_vm3, 0, %v350_v31 }
  0xdb   :  { %v532_v53 = vadd.s32 4294967294, %v331_v61  ;;  %572 = vcosq.f32 %v455_v1  ;;  %vm151_vm6 = vcmp.eq.s32.totalorder %v149_v32, 0  ;;  %vm154_vm7 = vcmp.eq.s32.totalorder %v149_v32, 2 }
  0xdc   :  { %v565_v5 = vpop.eup %564  ;;  %574 = vsinq.f32 %v455_v1  ;;  %vm254_vm8 = vcmp.lt.s32.totalorder %v253_v7, 2  ;;  %v356_v6 = vadd.s32 3, %v352_v58  ;;  %v461_v45 = vand.u32 3, %v460_v39 }
  0xdd   :  { %vm533_vm15 = vcmp.lt.s32.totalorder %v532_v53, 0  ;;  %v567_v62 = vpop.eup %566  ;;  %v259_v35 = vxor.u32 2147483648, %v565_v5  ;;  %vm150_vm9 = vcmp.lt.s32.totalorder %v149_v32, 2  ;;  %vm251_vm10 = vweird.f32 %v680_v22  ;;  %v489_v34 = vpop.permute.xlu1 %488 }
  0xde   :  { %v334_v8 = vsel %vm533_vm15, 0, %v532_v53  ;;  %v569_v42 = vpop.eup %568  ;;  %v256_v18 = vxor.u32 2147483648, %v567_v62  ;;  %v357_v44 = vand.u32 3, %v356_v6  ;;  %vm147_vm11 = vweird.f32 %v667_v13 }
  0xdf   :  { %v335_v10 = vsub.s32 32, %v334_v8  ;;  %v339_v48 = vsub.s32 4294967266, %v334_v8  ;;  %v336_v16 = vshll.u32 %v327_v4, %v334_v8  ;;  %v571_v26 = vpop.eup %570  ;;  %v155_v38 = vxor.u32 2147483648, %v569_v42  ;;  %v474_v8 = vpop.permute.xlu0 %473 }
  0xe0   :  { %v152_v4 = vxor.u32 2147483648, %v571_v26  ;;  %v257_v57 = vsel %vm255_vm4, %v565_v5, %v256_v18  ;;  %v260_v40 = vsel %vm258_vm5, %v259_v35, %v567_v62  ;;  %vm463_vm12 = vcmp.eq.s32.totalorder %v461_v45, 0 }
  0xe1   :  { %v337_v20 = vshrl.u32 %v319_v2, %v335_v10  ;;  %v340_v60 = vadd.s32 127, %v339_v48  ;;  %v156_v43 = vsel %vm154_vm7, %v155_v38, %v571_v26  ;;  %v261_v61 = vsel %vm254_vm8, %v257_v57, %v260_v40 }
  0xe2   :  { %v153_v55 = vsel %vm151_vm6, %v569_v42, %v152_v4  ;;  %v262_v3 = vsel %vm251_vm10, nan, %v261_v61  ;;  %vm466_vm13 = vcmp.eq.s32.totalorder %v461_v45, 2  ;;  %vm462_vm14 = vcmp.lt.s32.totalorder %v461_v45, 2 }
  0xe3   :  { %v338_v51 = vor.u32 %v337_v20, %v336_v16  ;;  %v341_v14 = vshll.u32 %v340_v60, 23  ;;  %v157_v53 = vsel %vm150_vm9, %v153_v55, %v156_v43  ;;  %v492_v52 = vmul.f32 %v479_v9, %v262_v3 }
  0xe4   :  { %v158_v2 = vsel %vm147_vm11, nan, %v157_v53  ;;  %vm362_vm15 = vcmp.eq.s32.totalorder %v357_v44, 2  ;;  %vm359_vm0 = vcmp.eq.s32.totalorder %v357_v44, 0  ;;  %vm358_vm1 = vcmp.lt.s32.totalorder %v357_v44, 2 }
  0xe5   :  { %v342_v36 = vor.u32 4788187, %v341_v14  ;;  %v345_v50 = vcvt.s32.f32 %v338_v51  ;;  %v573_v24 = vpop.eup %572  ;;  %v491_v22 = vmul.f32 %v474_v8, %v158_v2  ;;  %v484_v14 = vpop.permute.xlu0 %483 }
  0xe6   :  { %v575_v41 = vpop.eup %574  ;;  %v467_v49 = vxor.u32 2147483648, %v573_v24 }
  0xe7   :  { %v343_v15 = vand.u32 2147483647, %v342_v36  ;;  %v464_v47 = vxor.u32 2147483648, %v575_v41  ;;  %v495_v56 = vadd.f32 %v492_v52, %v491_v22 }
  0xe8   :  { %v468_v48 = vsel %vm466_vm13, %v467_v49, %v575_v41 }
  0xe9   :  { %v346_v23 = vmul.f32 %v345_v50, %v343_v15  ;;  %v465_v10 = vsel %vm463_vm12, %v573_v24, %v464_v47 }
  0xea   :  { %v469_v20 = vsel %vm462_vm14, %v465_v10, %v468_v48 }
  0xeb   :  { %v347_v25 = vxor.u32 2147483648, %v346_v23 }
  0xed   :  { %v348_v37 = vsel %vm265_vm2, %v347_v25, %v346_v23  ;;  %vm459_vm2 = vweird.f32 %v678_v21  ;;  %v505_v21 = vstv %s1061_s3 }
  0xee   :  { %v351_v33 = vsel %vm1029_vm3, %v676_v17, %v348_v37  ;;  %vm355_vm3 = vweird.f32 %v676_v17  ;;  %v470_v51 = vsel %vm459_vm2, nan, %v469_v20 }
  0xef   :  { %576 = vcosq.f32 %v351_v33  ;;  %v494_v36 = vmul.f32 %v489_v34, %v470_v51 }
  0xf0   :  { %578 = vsinq.f32 %v351_v33 }
  0xf9   :  { %v577_v30 = vpop.eup %576 }
  0xfa   :  { %v579_v27 = vpop.eup %578  ;;  %v363_v11 = vxor.u32 2147483648, %v577_v30 }
  0xfb   :  { %v360_v16 = vxor.u32 2147483648, %v579_v27 }
  0xfc   :  { %v364_v60 = vsel %vm362_vm15, %v363_v11, %v579_v27 }
  0xfd   :  { %v361_v13 = vsel %vm359_vm0, %v577_v30, %v360_v16 }
  0xfe   :  { %v365_v54 = vsel %vm358_vm1, %v361_v13, %v364_v60 }
  0xff   :  { %v366_v19 = vsel %vm355_vm3, nan, %v365_v54 }
 0x100   :  { %v493_v1 = vmul.f32 %v484_v14, %v366_v19 }
 0x102   :  { %v496_v46 = vadd.f32 %v495_v56, %v493_v1 }
 0x104   :  { %v497_v63 = vadd.f32 %v496_v46, %v494_v36 }
 0x106   :  { %v498_v15 = vrot.slane %v497_v63, 4 }
 0x108   :  { %v499_v50 = vadd.f32 %v498_v15, %v497_v63 }
 0x10a   :  { %v500_v5 = vrot.slane %v499_v50, 2 }
 0x10c   :  { %v501_v62 = vadd.f32 %v500_v5, %v499_v50 }
 0x10e   :  { %v502_v28 = vrot.slane %v501_v62, 1 }
 0x110   :  { %v503_v17 = vadd.f32 %v502_v28, %v501_v62 }
 0x112   :  { %v506_v23 = vadd.f32 %v505_v21, %v503_v17 }
 0x114   :  { %507 = vst [vmem:[#allocation3] sm:$0x1] %v506_v23 }
 0x115   :  { %591 = shalt.err (!%p588_p4)
}
 0x116   :  { %s592_s18 = scalar_lea.hbm %s1062_s4, 16 }
 0x117   :  { %p593_p5 = scmp.ne.s32.totalorder %s1062_s4, %s592_s18  ;;  %p596_p6 = scmp.lt.u32.totalorder %s592_s18, %s1062_s4 }
 0x119   :  { %p598_p7 = pnand %p596_p6, %p593_p5 }
 0x11b   :  { %601 = shalt.err (!%p598_p7)
}
 0x11c   :  { %517 = dma.vmem_to_hbm [thread:$0]  %s515_s13, 16, %s1062_s4, [#allocation4]  }
 0x11d   :  { %602 = dma.done.wait [#allocation4], 16  }
 0x11e   :  { %603 = vsyncadd [#allocation4], 4294967280 }
 0x11f   :  { %521 = vsyncpa [#allocation4], 1 }

</bundles_post_ra>
